<compile_context>
chip_gen: v5e
topology: v5e:2x2
jax: 0.10.0
libtpu: 0.0.40
codegen_flags: <defaults>
</compile_context>

<pallas_src>
import functools
import math

import jax
import jax.numpy as jnp
from jax import lax
from jax.experimental import pallas as pl
from jax.experimental.pallas import tpu as pltpu


# ---------------------------------------------------------------------------
# Generation-aware sizing helpers
# ---------------------------------------------------------------------------

_FALLBACK_VMEM_CAP = 64 * 1024 * 1024  # conservative: v7x has 64 MiB per TC


def _vmem_capacity_bytes():
    """Per-core VMEM capacity (128 MiB v5e/v6e, 64 MiB v7x); safe fallback."""
    try:
        cap = int(getattr(pltpu.get_tpu_info(), "vmem_capacity_bytes", 0))
        if cap > 0:
            return cap
    except Exception:
        pass
    return _FALLBACK_VMEM_CAP


def _vmem_limit_bytes():
    # ~5/8 of per-core VMEM: ~40 MiB on v7x, ~80 MiB on v5e/v6e.  Leaves
    # headroom for Mosaic internal scratch while still letting large blocks
    # double-buffer (scoped defaults are only 16/32 MiB).
    return (_vmem_capacity_bytes() * 5) // 8


def _sublane_multiple(dtype):
    # Sub-32-bit dtypes pack along sublanes: 8 rows f32, 16 bf16, 32 int8/fp8.
    return max(8, 32 // jnp.dtype(dtype).itemsize)


def _pick_tile_rows(rows, features, dtype):
    """Row-tile for a (rows, features) layernorm: big blocks, grid >= 2 if possible."""
    itemsize = jnp.dtype(dtype).itemsize
    sub = _sublane_multiple(dtype)

    # ~1/3 of per-core VMEM for the pipelined working set:
    # 2x double-buffered input + 2x output (native dtype) + ~2 f32 temporaries.
    budget = _vmem_capacity_bytes() // 3
    per_row_bytes = features * (4 * itemsize + 2 * 4)
    tile = max(sub, budget // max(per_row_bytes, 1))

    # Keep at least 2 grid steps when possible so both v7x TensorCores get
    # work and the prefetch/writeback pipeline stays alive on all generations.
    half = ((rows + 1) // 2 + sub - 1) // sub * sub
    tile = min(tile, max(half, sub))

    if tile >= rows:
        return rows                        # single full-extent block (always legal)
    return max(sub, (tile // sub) * sub)   # partial tail block is masked by Pallas


# ---------------------------------------------------------------------------
# Kernels
# ---------------------------------------------------------------------------

def _layernorm_kernel(x_ref, a_ref, b_ref, o_ref, *, eps, features):
    """General path: one logical row per kernel row."""
    x = x_ref[...].astype(jnp.float32)                       # (tile_rows, features)
    mean = jnp.sum(x, axis=-1, keepdims=True) * (1.0 / features)
    centered = x - mean
    # Unbiased (ddof=1) variance: matches torch.Tensor.std default.
    # NOTE: features == 1 yields NaN (0/0), matching torch.std semantics.
    var = jnp.sum(centered * centered, axis=-1, keepdims=True) * (1.0 / (features - 1))
    inv = 1.0 / (jnp.sqrt(var) + eps)                        # eps added to std, not var
    o_ref[...] = (a_ref[...] * (centered * inv) + b_ref[...]).astype(o_ref.dtype)


def _layernorm_packed_kernel(x_ref, a_ref, b_ref, s_ref, o_ref, *, eps, features):
    """Lane-dense path: g = width//features logical rows packed per kernel row.

    s_ref is a (width, width) 0/1 block-diagonal "group sum + broadcast"
    matrix: (x @ S)[:, j] = sum over the feature-group that lane j belongs to,
    so per-group statistics come back already broadcast to every lane.
    """
    x = x_ref[...].astype(jnp.float32)                       # (tile_rows, width)
    s = s_ref[...]                                           # (width, width) f32
    mean = jnp.dot(x, s, precision=lax.Precision.HIGHEST,
                   preferred_element_type=jnp.float32) * (1.0 / features)
    centered = x - mean
    var = jnp.dot(centered * centered, s, precision=lax.Precision.HIGHEST,
                  preferred_element_type=jnp.float32) * (1.0 / (features - 1))
    inv = 1.0 / (jnp.sqrt(var) + eps)
    o_ref[...] = (a_ref[...] * (centered * inv) + b_ref[...]).astype(o_ref.dtype)


# ---------------------------------------------------------------------------
# pallas_call wrappers
# ---------------------------------------------------------------------------

def _layer_norm_2d(x2, a2, b2, eps, tile_rows):
    rows, features = x2.shape
    if tile_rows is None:
        tile_rows = _pick_tile_rows(rows, features, x2.dtype)
    grid = (pl.cdiv(rows, tile_rows),)
    return pl.pallas_call(
        functools.partial(_layernorm_kernel, eps=eps, features=features),
        out_shape=jax.ShapeDtypeStruct((rows, features), x2.dtype),
        grid_spec=pltpu.PrefetchScalarGridSpec(
            num_scalar_prefetch=0,
            grid=grid,
            in_specs=[
                pl.BlockSpec((tile_rows, features), lambda i: (i, 0)),
                pl.BlockSpec((1, features), lambda i: (0, 0)),   # grid-invariant
                pl.BlockSpec((1, features), lambda i: (0, 0)),   # grid-invariant
            ],
            out_specs=pl.BlockSpec((tile_rows, features), lambda i: (i, 0)),
        ),
        compiler_params=pltpu.CompilerParams(
            dimension_semantics=("parallel",),                  # megacore on v7x
            vmem_limit_bytes=_vmem_limit_bytes(),
        ),
    )(x2, a2, b2)


def _layer_norm_2d_packed(x2, a2, b2, eps, g, tile_rows):
    rows, features = x2.shape
    width = g * features                                        # multiple of 128
    packed_rows = rows // g
    xp = x2.reshape(packed_rows, width)                         # contiguous: free reshape
    ap = jnp.tile(a2, (1, g))                                   # lane j -> a[j % features]
    bp = jnp.tile(b2, (1, g))
    grp = jnp.arange(width, dtype=jnp.int32) // features
    s = (grp[:, None] == grp[None, :]).astype(jnp.float32)      # block-diagonal ones

    if tile_rows is None:
        tile_rows = _pick_tile_rows(packed_rows, width, x2.dtype)
    grid = (pl.cdiv(packed_rows, tile_rows),)
    out = pl.pallas_call(
        functools.partial(_layernorm_packed_kernel, eps=eps, features=features),
        out_shape=jax.ShapeDtypeStruct((packed_rows, width), x2.dtype),
        grid_spec=pltpu.PrefetchScalarGridSpec(
            num_scalar_prefetch=0,
            grid=grid,
            in_specs=[
                pl.BlockSpec((tile_rows, width), lambda i: (i, 0)),
                pl.BlockSpec((1, width), lambda i: (0, 0)),      # grid-invariant
                pl.BlockSpec((1, width), lambda i: (0, 0)),      # grid-invariant
                pl.BlockSpec((width, width), lambda i: (0, 0)),  # grid-invariant
            ],
            out_specs=pl.BlockSpec((tile_rows, width), lambda i: (i, 0)),
        ),
        compiler_params=pltpu.CompilerParams(
            dimension_semantics=("parallel",),
            vmem_limit_bytes=_vmem_limit_bytes(),
        ),
    )(xp, ap, bp, s)
    return out.reshape(rows, features)


def layer_norm(x, a_2, b_2, eps=1e-6, tile_rows=None):
    """a_2 * (x - mean) / (std_ddof1 + eps) + b_2 over the last axis of x."""
    orig_shape = x.shape
    features = orig_shape[-1]
    rows = math.prod(orig_shape[:-1]) if len(orig_shape) > 1 else 1

    x2 = x.reshape(rows, features)
    # Cast params once outside the grid; kernel keeps them VMEM-resident.
    a2 = a_2.astype(jnp.float32).reshape(1, features)
    b2 = b_2.astype(jnp.float32).reshape(1, features)

    # Lane-dense packing: when `features` divides 128, pack g = 128//features
    # logical rows per kernel row so output stores are full-width vst's.
    # TODO(synk): features that neither divide into nor are a multiple of 128
    # still take the lane-sparse general path (would need padding + masking).
    g = 128 // features if (1 < features < 128 and 128 % features == 0) else 1
    if g > 1 and rows % g == 0:
        out = _layer_norm_2d_packed(x2, a2, b2, eps, g, tile_rows)
    else:
        out = _layer_norm_2d(x2, a2, b2, eps, tile_rows)
    return out.reshape(orig_shape)


if __name__ == "__main__":
    key = jax.random.PRNGKey(0)
    k_x, k_a, k_b, k_x2 = jax.random.split(key, 4)

    batch, seq, hidden = 2, 8, 32
    eps = 1e-6
    x = jax.random.normal(k_x, (batch, seq, hidden), dtype=jnp.float32)
    # Module init is ones/zeros; perturb slightly so parameter-tiling bugs in
    # the packed path would be caught by the check.
    a_2 = jnp.ones((hidden,), jnp.float32) + 0.1 * jax.random.normal(k_a, (hidden,), jnp.float32)
    b_2 = 0.1 * jax.random.normal(k_b, (hidden,), jnp.float32)

    def ref_ln(xv, av, bv):
        mean = jnp.mean(xv, axis=-1, keepdims=True)
        std = jnp.std(xv, axis=-1, keepdims=True, ddof=1)   # unbiased, like torch.std
        return av * (xv - mean) / (std + eps) + bv

    y = jax.block_until_ready(layer_norm(x, a_2, b_2, eps=eps))
    assert y.shape == x.shape and y.dtype == x.dtype
    assert jnp.allclose(y, ref_ln(x, a_2, b_2), atol=1e-4, rtol=1e-4), \
        "packed (lane-dense) path mismatch vs reference"

    # Also exercise the general path (features already a multiple of 128).
    hidden2 = 256
    x_b = jax.random.normal(k_x2, (4, hidden2), dtype=jnp.float32)
    a_b = jnp.ones((hidden2,), jnp.float32)
    b_b = jnp.zeros((hidden2,), jnp.float32)
    y_b = jax.block_until_ready(layer_norm(x_b, a_b, b_b, eps=eps))
    assert jnp.allclose(y_b, ref_ln(x_b, a_b, b_b), atol=1e-4, rtol=1e-4), \
        "general path mismatch vs reference"

    print("KERNEL_OK")
</pallas_src>

<mosaic_0001>
module attributes {stable_mosaic.version = 11 : i64} {
  func.func @_layernorm_packed_kernel(%arg0: i32, %arg1: memref<4x128xf32, #tpu.memory_space<vmem>>, %arg2: memref<1x128xf32, #tpu.memory_space<vmem>>, %arg3: memref<1x128xf32, #tpu.memory_space<vmem>>, %arg4: memref<128x128xf32, #tpu.memory_space<vmem>>, %arg5: memref<4x128xf32, #tpu.memory_space<vmem>>) attributes {dimension_semantics = [#tpu.dimension_semantics<parallel>], iteration_bounds = array<i64: 1>, scalar_prefetch = 0 : i64, scratch_operands = 0 : i64, tpu.core_type = #tpu.core_type<tc>, window_params = [{transform_indices = @transform_0, window_bounds = array<i64: 4, 128>}, {pipeline_mode = #tpu.pipeline_mode<synchronous>, transform_indices = @transform_1, window_bounds = array<i64: 1, 128>}, {pipeline_mode = #tpu.pipeline_mode<synchronous>, transform_indices = @transform_2, window_bounds = array<i64: 1, 128>}, {pipeline_mode = #tpu.pipeline_mode<synchronous>, transform_indices = @transform_3, window_bounds = array<i64: 128, 128>}, {transform_indices = @transform_4, window_bounds = array<i64: 4, 128>}]} {
    %c0 = arith.constant 0 : index
    %c0_0 = arith.constant 0 : index
    %0 = vector.load %arg1[%c0, %c0_0] : memref<4x128xf32, #tpu.memory_space<vmem>>, vector<4x128xf32>
    %c0_1 = arith.constant 0 : index
    %c0_2 = arith.constant 0 : index
    %1 = vector.load %arg4[%c0_1, %c0_2] : memref<128x128xf32, #tpu.memory_space<vmem>>, vector<128x128xf32>
    %cst = arith.constant dense<0.000000e+00> : vector<4x128xf32>
    %2 = tpu.matmul %0, %1, %cst {dimension_numbers = #tpu.dot_dimension_numbers<[1], [0], [0], [1], [0, 0, 1, 1], [], []>, precision = #tpu.contract_precision<fp32>} : vector<4x128xf32>, vector<128x128xf32>, vector<4x128xf32> -> vector<4x128xf32>
    %cst_3 = arith.constant 3.125000e-02 : f32
    %3 = vector.broadcast %cst_3 : f32 to vector<4x128xf32>
    %4 = arith.mulf %2, %3 : vector<4x128xf32>
    %5 = arith.subf %0, %4 : vector<4x128xf32>
    %6 = arith.mulf %5, %5 : vector<4x128xf32>
    %cst_4 = arith.constant dense<0.000000e+00> : vector<4x128xf32>
    %7 = tpu.matmul %6, %1, %cst_4 {dimension_numbers = #tpu.dot_dimension_numbers<[1], [0], [0], [1], [0, 0, 1, 1], [], []>, precision = #tpu.contract_precision<fp32>} : vector<4x128xf32>, vector<128x128xf32>, vector<4x128xf32> -> vector<4x128xf32>
    %cst_5 = arith.constant 0.0322580636 : f32
    %8 = vector.broadcast %cst_5 : f32 to vector<4x128xf32>
    %9 = arith.mulf %7, %8 : vector<4x128xf32>
    %10 = math.sqrt %9 : vector<4x128xf32>
    %cst_6 = arith.constant 9.99999997E-7 : f32
    %11 = vector.broadcast %cst_6 : f32 to vector<4x128xf32>
    %12 = arith.addf %10, %11 : vector<4x128xf32>
    %cst_7 = arith.constant 1.000000e+00 : f32
    %13 = vector.broadcast %cst_7 : f32 to vector<4x128xf32>
    %14 = arith.divf %13, %12 : vector<4x128xf32>
    %c0_8 = arith.constant 0 : index
    %c0_9 = arith.constant 0 : index
    %15 = vector.load %arg2[%c0_8, %c0_9] : memref<1x128xf32, #tpu.memory_space<vmem>>, vector<1x128xf32>
    %16 = arith.mulf %5, %14 : vector<4x128xf32>
    %17 = vector.broadcast %15 : vector<1x128xf32> to vector<4x128xf32>
    %18 = arith.mulf %17, %16 : vector<4x128xf32>
    %c0_10 = arith.constant 0 : index
    %c0_11 = arith.constant 0 : index
    %19 = vector.load %arg3[%c0_10, %c0_11] : memref<1x128xf32, #tpu.memory_space<vmem>>, vector<1x128xf32>
    %20 = vector.broadcast %19 : vector<1x128xf32> to vector<4x128xf32>
    %21 = arith.addf %18, %20 : vector<4x128xf32>
    %c0_12 = arith.constant 0 : index
    %c0_13 = arith.constant 0 : index
    %22 = vector.load %arg5[%c0_12, %c0_13] : memref<4x128xf32, #tpu.memory_space<vmem>>, vector<4x128xf32>
    tpu.vector_store %arg5[%c0_12, %c0_13], %21 {strides = array<i32>} : memref<4x128xf32, #tpu.memory_space<vmem>>, vector<4x128xf32>,
    return
  }
  func.func @transform_0(%arg0: i32) -> (i32, i32) {
    %c0_i32 = arith.constant 0 : i32
    %c0_i32_0 = arith.constant 0 : i32
    return %arg0, %c0_i32 : i32, i32
  }
  func.func @transform_1(%arg0: i32) -> (i32, i32) {
    %c0_i32 = arith.constant 0 : i32
    %c0_i32_0 = arith.constant 0 : i32
    %c0_i32_1 = arith.constant 0 : i32
    return %c0_i32, %c0_i32_0 : i32, i32
  }
  func.func @transform_2(%arg0: i32) -> (i32, i32) {
    %c0_i32 = arith.constant 0 : i32
    %c0_i32_0 = arith.constant 0 : i32
    %c0_i32_1 = arith.constant 0 : i32
    return %c0_i32, %c0_i32_0 : i32, i32
  }
  func.func @transform_3(%arg0: i32) -> (i32, i32) {
    %c0_i32 = arith.constant 0 : i32
    %c0_i32_0 = arith.constant 0 : i32
    %c0_i32_1 = arith.constant 0 : i32
    return %c0_i32, %c0_i32_0 : i32, i32
  }
  func.func @transform_4(%arg0: i32) -> (i32, i32) {
    %c0_i32 = arith.constant 0 : i32
    %c0_i32_0 = arith.constant 0 : i32
    return %arg0, %c0_i32 : i32, i32
  }
}

</mosaic_0001>

<bundles_post_ra>
// kernel: tpu_custom_call.1
= control target key start
LH: loop header
LB: loop body
LE: loop exit
PB: predicated region body
PF: predicated region fallthrough
CT: control target
= control target key end

     0   :  { %9 = vsyncpa [#allocation3], 0  ;;  %s1377_s0 = inlined_call_operand.hbm [shape: f32[4,128], index: 0, kind: input, shape index: {}]   ;;  %s1378_s1 = inlined_call_operand.hbm [shape: f32[1,128], index: 1, kind: input, shape index: {}]   ;;  %s1379_s2 = inlined_call_operand.vmem [shape: f32[1,128], index: 2, kind: input, shape index: {}]   ;;  %s1380_s3 = inlined_call_operand.hbm [shape: f32[128,128], index: 3, kind: input, shape index: {}]   ;;  %s1381_s4 = inlined_call_operand.hbm [shape: f32[4,128], index: 4, kind: output, shape index: {}]  }
   0x1   :  { %10 = vsyncpa [#allocation6], 0  ;;  %s28_s17 = sshll.u32 %s1378_s1, 4  ;;  %s29_s17 = int_to_ptr.hbm [resolvable:$true] %s28_s17 }
   0x2   :  { %11 = vsyncpa [#allocation4], 0  ;;  %s936_s18 = smov [#allocation5]   ;;  %s17_s22 = sshll.u32 %s1377_s0, 4  ;;  %s18_s22 = int_to_ptr.hbm [resolvable:$true] %s17_s22 }
   0x3   :  { %s30_s19 = sshll.u32 %s936_s18, 4  ;;  %s937_s23 = smov [#allocation2]   ;;  %s31_s19 = int_to_ptr.vmem [resolvable:$true] %s30_s19 }
   0x4   :  { %33 = dma.hbm_to_vmem [thread:$0]  %s29_s17, 16, %s31_s19, [#allocation6]  }
   0x5   :  { %s19_s24 = sshll.u32 %s937_s23, 4  ;;  %s40_s27 = sshll.u32 %s1380_s3, 4  ;;  %s20_s24 = int_to_ptr.vmem [resolvable:$true] %s19_s24  ;;  %s41_s27 = int_to_ptr.hbm [resolvable:$true] %s40_s27 }
   0x6   :  { %22 = dma.hbm_to_vmem [thread:$0]  %s18_s22, 64, %s20_s24, [#allocation3]  }
   0x7   :  { %s938_s1 = smov [#allocation7]   ;;  %s939_s29 = smov 128  }
   0x8   :  { %s42_s28 = sshll.u32 %s938_s1, 4  ;;  %s940_s30 = smov 8   ;;  %s43_s28 = int_to_ptr.vmem [resolvable:$true] %s42_s28 }
   0x9   :  { %48 = dma.hbm_to_vmem [thread:$0]  %s41_s27, 2048, %s43_s28, [#allocation6], %s939_s29, %s939_s29, %s940_s30  }
   0xa   :  { %930 = dma.done.wait [#allocation3], 64  }
   0xb   :  { %931 = vsyncadd [#allocation3], 4294967232 }
   0xc   :  { %932 = dma.done.wait [#allocation6], 2064  }
   0xd   :  { %933 = vsyncadd [#allocation6], 4294965232  ;;  %v77_v0 = vld [vmem:[#allocation7 + $0x78] sm:$0xff]  ;;  %v76_v1 = vld [vmem:[#allocation7 + $0x70] sm:$0xff]  ;;  %s941_s5 = smov [#allocation8]   ;;  %s811_s9 = sshll.u32 %s1381_s4, 4  ;;  %s812_s9 = int_to_ptr.hbm [resolvable:$true] %s811_s9 }
   0xe   :  { %v75_v2 = vld [vmem:[#allocation7 + $0x68] sm:$0xff]  ;;  %v976_v3 = vand.u32 4294901760, %v77_v0  ;;  %v978_v4 = vand.u32 4294901760, %v76_v1  ;;  %v74_v6 = vld [vmem:[#allocation7 + $0x60] sm:$0xff]  ;;  %v73_v7 = vld [vmem:[#allocation7 + $0x58] sm:$0xff]  ;;  %s809_s6 = sshll.u32 %s941_s5, 4  ;;  %s810_s6 = int_to_ptr.vmem [resolvable:$true] %s809_s6 }
   0xf   :  { %v980_v5 = vand.u32 4294901760, %v75_v2  ;;  %v72_v8 = vld [vmem:[#allocation7 + $0x50] sm:$0xff]  ;;  %v982_v9 = vand.u32 4294901760, %v74_v6  ;;  %v984_v10 = vand.u32 4294901760, %v73_v7  ;;  %v71_v12 = vld [vmem:[#allocation7 + $0x48] sm:$0xff]  ;;  %v70_v13 = vld [vmem:[#allocation7 + $0x40] sm:$0xff] }
  0x10   :  { %v986_v11 = vand.u32 4294901760, %v72_v8  ;;  %79 = vmatpush.msra.mxu0 %v976_v3  ;;  %v990_v14 = vsub.f32 %v77_v0, %v976_v3  ;;  %v993_v15 = vsub.f32 %v76_v1, %v978_v4  ;;  %v998_v17 = vand.u32 4294901760, %v71_v12  ;;  %v69_v18 = vld [vmem:[#allocation7 + $0x38] sm:$0xff]  ;;  %275 = vmatpush.msra.mxu3 %v976_v3  ;;  %v68_v26 = vld [vmem:[#allocation7 + $0x30] sm:$0xff]  ;;  %v67_v36 = vld [vmem:[#allocation7 + $0x28] sm:$0xff] }
  0x11   :  { %v996_v16 = vsub.f32 %v75_v2, %v980_v5  ;;  %v1002_v19 = vsub.f32 %v74_v6, %v982_v9  ;;  %v1005_v20 = vsub.f32 %v73_v7, %v984_v10  ;;  %v1020_v25 = vand.u32 4294901760, %v70_v13  ;;  %v66_v42 = vld [vmem:[#allocation7 + $0x20] sm:$0xff]  ;;  %v65_v47 = vld [vmem:[#allocation7 + $0x18] sm:$0xff]  ;;  %v64_v55 = vld [vmem:[#allocation7 + $0x10] sm:$0xff] }
  0x12   :  { %v1008_v21 = vsub.f32 %v72_v8, %v986_v11  ;;  %81 = vmatpush.msra.mxu0 %v978_v4  ;;  %v1012_v22 = vand.u32 4294901760, %v990_v14  ;;  %v1015_v23 = vand.u32 4294901760, %v993_v15  ;;  %222 = vmatpush.msra.mxu2 %v990_v14  ;;  %v1026_v28 = vand.u32 4294901760, %v69_v18  ;;  %v63_v60 = vld [vmem:[#allocation7 + $0x8] sm:$0xff]  ;;  %v62_v1 = vld [vmem:[#allocation7] sm:$0xff] }
  0x13   :  { %v1018_v24 = vand.u32 4294901760, %v996_v16  ;;  %v1024_v27 = vand.u32 4294901760, %v1002_v19  ;;  %v1029_v29 = vsub.f32 %v71_v12, %v998_v17  ;;  %277 = vmatpush.msra.mxu3 %v978_v4  ;;  %v1040_v33 = vand.u32 4294901760, %v1005_v20  ;;  %v1130_v7 = vld [vmem:[#allocation2] sm:$0xf] }
  0x14   :  { %83 = vmatpush.msra.mxu0 %v980_v5  ;;  %v122_v30 = vsub.f32 %v990_v14, %v1012_v22  ;;  %v128_v31 = vsub.f32 %v993_v15, %v1015_v23  ;;  %225 = vmatpush.msra.mxu2 %v993_v15  ;;  %v1044_v34 = vand.u32 4294901760, %v1008_v21  ;;  %v1046_v35 = vand.u32 4294901760, %v68_v26  ;;  %1396 = vst [vmem:[#allocation18_spill] sm:$0xff] %v1130_v7 }
  0x15   :  { %v134_v32 = vsub.f32 %v996_v16, %v1018_v24  ;;  %279 = vmatpush.msra.mxu3 %v980_v5  ;;  %v140_v39 = vsub.f32 %v1002_v19, %v1024_v27  ;;  %v1057_v40 = vsub.f32 %v70_v13, %v1020_v25  ;;  %v1061_v41 = vand.u32 4294901760, %v1029_v29 }
  0x16   :  { %v1049_v37 = vand.u32 4294901760, %v122_v30  ;;  %85 = vmatpush.msra.mxu0 %v982_v9  ;;  %v1052_v38 = vand.u32 4294901760, %v128_v31  ;;  %228 = vmatpush.msra.mxu2 %v996_v16  ;;  %v146_v44 = vsub.f32 %v1005_v20, %v1040_v33  ;;  %v1070_v45 = vand.u32 4294901760, %v67_v36 }
  0x17   :  { %1390 = vst [vmem:[#allocation12_spill] sm:$0xff] %v1057_v40  ;;  %281 = vmatpush.msra.mxu3 %v982_v9  ;;  %v1066_v43 = vand.u32 4294901760, %v134_v32  ;;  %v1073_v46 = vsub.f32 %v69_v18, %v1026_v28  ;;  %v152_v48 = vsub.f32 %v1008_v21, %v1044_v34  ;;  %v1081_v49 = vand.u32 4294901760, %v140_v39 }
  0x18   :  { %124 = vmatpush.msra.mxu1 %v1049_v37  ;;  %87 = vmatpush.msra.mxu0 %v984_v10  ;;  %v1084_v50 = vand.u32 4294901760, %v1057_v40  ;;  %v1086_v51 = vand.u32 4294901760, %v66_v42  ;;  %v1089_v52 = vsub.f32 %v68_v26, %v1046_v35  ;;  %v158_v53 = vsub.f32 %v1029_v29, %v1061_v41 }
  0x19   :  { %1391 = vst [vmem:[#allocation13_spill] sm:$0xff] %v1073_v46  ;;  %231 = vmatpush.msra.mxu2 %v1002_v19  ;;  %283 = vmatpush.msra.mxu3 %v984_v10  ;;  %v1093_v54 = vand.u32 4294901760, %v65_v47  ;;  %v1099_v56 = vand.u32 4294901760, %v146_v44  ;;  %v1102_v57 = vand.u32 4294901760, %v1073_v46  ;;  %v1105_v58 = vsub.f32 %v67_v36, %v1070_v45 }
  0x1a   :  { %130 = vmatpush.msra.mxu1 %v1052_v38  ;;  %89 = vmatpush.msra.mxu0 %v986_v11  ;;  %1392 = vst [vmem:[#allocation14_spill] sm:$0xff] %v1089_v52  ;;  %v1107_v59 = vand.u32 4294901760, %v152_v48  ;;  %v164_v61 = vsub.f32 %v1057_v40, %v1084_v50  ;;  %v1116_v62 = vand.u32 4294901760, %v1089_v52  ;;  %v1118_v63 = vand.u32 4294901760, %v64_v55 }
  0x1b   :  { %234 = vmatpush.msra.mxu2 %v1005_v20  ;;  %285 = vmatpush.msra.mxu3 %v986_v11  ;;  %1393 = vst [vmem:[#allocation15_spill] sm:$0xff] %v1105_v58  ;;  %v1121_v0 = vsub.f32 %v66_v42, %v1086_v51  ;;  %v1123_v2 = vand.u32 4294901760, %v158_v53  ;;  %v1126_v6 = vsub.f32 %v65_v47, %v1093_v54  ;;  %v1137_v12 = vand.u32 4294901760, %v1105_v58 }
  0x1c   :  { %136 = vmatpush.msra.mxu1 %v1066_v43  ;;  %91 = vmatpush.msra.mxu0 %v998_v17  ;;  %v170_v8 = vsub.f32 %v1073_v46, %v1102_v57  ;;  %v1139_v13 = vand.u32 4294901760, %v63_v60  ;;  %v1142_v18 = vand.u32 4294901760, %v1130_v7  ;;  %v1144_v26 = vand.u32 4294901760, %v62_v1 }
  0x1d   :  { %237 = vmatpush.msra.mxu2 %v1008_v21  ;;  %287 = vmatpush.msra.mxu3 %v998_v17  ;;  %1394 = vst [vmem:[#allocation16_spill] sm:$0xff] %v1121_v0  ;;  %v1150_v30 = vand.u32 4294901760, %v164_v61  ;;  %v176_v31 = vsub.f32 %v1089_v52, %v1116_v62  ;;  %v1155_v32 = vand.u32 4294901760, %v1121_v0  ;;  %v1158_v36 = vsub.f32 %v64_v55, %v1118_v63 }
  0x1e   :  { %142 = vmatpush.msra.mxu1 %v1081_v49  ;;  %93 = vmatpush.msra.mxu0 %v1020_v25  ;;  %1395 = vst [vmem:[#allocation17_spill] sm:$0xff] %v1126_v6  ;;  %v1161_v39 = vand.u32 4294901760, %v1126_v6  ;;  %v1167_v42 = vand.u32 4294901760, %v170_v8  ;;  %v182_v44 = vsub.f32 %v1105_v58, %v1137_v12  ;;  %v1172_v47 = vsub.f32 %v63_v60, %v1139_v13 }
  0x1f   :  { %240 = vmatpush.msra.mxu2 %v1029_v29  ;;  %289 = vmatpush.msra.mxu3 %v1020_v25  ;;  %1397 = vst [vmem:[#allocation19_spill] sm:$0xff] %v1158_v36  ;;  %v111_v48 = vsub.f32 %v1130_v7, %v1142_v18  ;;  %v1180_v53 = vand.u32 4294901760, %v176_v31  ;;  %v188_v55 = vsub.f32 %v1121_v0, %v1155_v32  ;;  %v1185_v61 = vand.u32 4294901760, %v1158_v36 }
  0x20   :  { %148 = vmatpush.msra.mxu1 %v1099_v56  ;;  %95 = vmatpush.msra.mxu0 %v1026_v28  ;;  %v1188_v60 = vsub.f32 %v62_v1, %v1144_v26  ;;  %v1194_v8 = vand.u32 4294901760, %v182_v44  ;;  %v194_v31 = vsub.f32 %v1126_v6, %v1161_v39  ;;  %v1199_v7 = vand.u32 4294901760, %v1172_v47 }
  0x21   :  { %243 = vmatpush.msra.mxu2 %v1057_v40  ;;  %291 = vmatpush.msra.mxu3 %v1026_v28  ;;  %v1205_v1 = vand.u32 4294901760, %v188_v55  ;;  %v200_v44 = vsub.f32 %v1158_v36, %v1185_v61 }
  0x22   :  { %154 = vmatpush.msra.mxu1 %v1107_v59  ;;  %97 = vmatpush.msra.mxu0 %v1046_v35  ;;  %v206_v55 = vsub.f32 %v1172_v47, %v1199_v7 }
  0x23   :  { %246 = vmatpush.msra.mxu2 %v1073_v46  ;;  %293 = vmatpush.msra.mxu3 %v1046_v35 }
  0x24   :  { %160 = vmatpush.msra.mxu1 %v1123_v2  ;;  %99 = vmatpush.msra.mxu0 %v1070_v45 }
  0x25   :  { %249 = vmatpush.msra.mxu2 %v1089_v52  ;;  %295 = vmatpush.msra.mxu3 %v1070_v45  ;;  %v112_v52 = vand.u32 4294901760, %v111_v48 }
  0x26   :  { %166 = vmatpush.msra.mxu1 %v1150_v30  ;;  %101 = vmatpush.msra.mxu0 %v1086_v51 }
  0x27   :  { %252 = vmatpush.msra.mxu2 %v1105_v58  ;;  %297 = vmatpush.msra.mxu3 %v1086_v51  ;;  %v1210_v58 = vand.u32 4294901760, %v1188_v60  ;;  %v113_v46 = vsub.f32 %v111_v48, %v112_v52 }
  0x28   :  { %172 = vmatpush.msra.mxu1 %v1167_v42  ;;  %103 = vmatpush.msra.mxu0 %v1093_v54 }
  0x29   :  { %255 = vmatpush.msra.mxu2 %v1121_v0  ;;  %299 = vmatpush.msra.mxu3 %v1093_v54  ;;  %v1216_v0 = vand.u32 4294901760, %v194_v31  ;;  %v212_v40 = vsub.f32 %v1188_v60, %v1210_v58  ;;  %v1231_v31 = vand.u32 4294901760, %v206_v55 }
  0x2a   :  { %178 = vmatpush.msra.mxu1 %v1180_v53  ;;  %105 = vmatpush.msra.mxu0 %v1118_v63 }
  0x2b   :  { %258 = vmatpush.msra.mxu2 %v1126_v6  ;;  %301 = vmatpush.msra.mxu3 %v1118_v63  ;;  %v1224_v6 = vand.u32 4294901760, %v200_v44  ;;  %v1237_v44 = vand.u32 4294901760, %v212_v40 }
  0x2c   :  { %184 = vmatpush.msra.mxu1 %v1194_v8  ;;  %107 = vmatpush.msra.mxu0 %v1139_v13 }
  0x2d   :  { %261 = vmatpush.msra.mxu2 %v1158_v36  ;;  %303 = vmatpush.msra.mxu3 %v1139_v13  ;;  %v114_v36 = vand.u32 4294901760, %v113_v46 }
  0x2e   :  { %190 = vmatpush.msra.mxu1 %v1205_v1  ;;  %109 = vmatpush.msra.mxu0 %v1144_v26 }
  0x2f   :  { %264 = vmatpush.msra.mxu2 %v1172_v47  ;;  %305 = vmatpush.msra.mxu3 %v1144_v26 }
  0x30   :  { %316 = vmatpush.msrb.mxu0 %v1012_v22  ;;  %196 = vmatpush.msra.mxu1 %v1216_v0 }
  0x31   :  { %267 = vmatpush.msra.mxu2 %v1188_v60  ;;  %309 = vmatmul.f32.vlgmr.msra.gmra.mxu3 %v112_v52 }
  0x32   :  { %320 = vmatpush.msrb.mxu0 %v1015_v23  ;;  %202 = vmatpush.msra.mxu1 %v1224_v6 }
  0x33   :  { %270 = vmatmul.f32.vlgmr.msra.gmra.mxu2 %v111_v48  ;;  %115 = vmatmul.f32.vlgmr.msra.gmra.mxu0 %v114_v36 }
  0x34   :  { %324 = vmatpush.msrb.mxu0 %v1018_v24  ;;  %208 = vmatpush.msra.mxu1 %v1231_v31 }
  0x35   :  { %468 = vmatpush.msrb.mxu3 %v1049_v37  ;;  %423 = vmatpush.msrb.mxu2 %v976_v3 }
  0x36   :  { %328 = vmatpush.msrb.mxu0 %v1024_v27  ;;  %214 = vmatpush.msra.mxu1 %v1237_v44 }
  0x37   :  { %216 = vmatmul.f32.vlgmr.msra.gmra.mxu1 %v1142_v18  ;;  %474 = vmatpush.msrb.mxu3 %v1052_v38 }
  0x38   :  { %383 = vmatpush.msrb.mxu1 %v976_v3  ;;  %332 = vmatpush.msrb.mxu0 %v1040_v33 }
  0x39   :  { %480 = vmatpush.msrb.mxu3 %v1066_v43  ;;  %425 = vmatpush.msrb.mxu2 %v978_v4 }
  0x3a   :  { %385 = vmatpush.msrb.mxu1 %v978_v4  ;;  %336 = vmatpush.msrb.mxu0 %v1044_v34 }
  0x3b   :  { %486 = vmatpush.msrb.mxu3 %v1081_v49  ;;  %427 = vmatpush.msrb.mxu2 %v980_v5 }
  0x3c   :  { %387 = vmatpush.msrb.mxu1 %v980_v5  ;;  %340 = vmatpush.msrb.mxu0 %v1061_v41 }
  0x3d   :  { %492 = vmatpush.msrb.mxu3 %v1099_v56  ;;  %429 = vmatpush.msrb.mxu2 %v982_v9 }
  0x3e   :  { %389 = vmatpush.msrb.mxu1 %v982_v9  ;;  %344 = vmatpush.msrb.mxu0 %v1084_v50 }
  0x3f   :  { %498 = vmatpush.msrb.mxu3 %v1107_v59  ;;  %431 = vmatpush.msrb.mxu2 %v984_v10 }
  0x40   :  { %391 = vmatpush.msrb.mxu1 %v984_v10  ;;  %348 = vmatpush.msrb.mxu0 %v1102_v57 }
  0x41   :  { %504 = vmatpush.msrb.mxu3 %v1123_v2  ;;  %433 = vmatpush.msrb.mxu2 %v986_v11 }
  0x42   :  { %393 = vmatpush.msrb.mxu1 %v986_v11  ;;  %352 = vmatpush.msrb.mxu0 %v1116_v62 }
  0x43   :  { %510 = vmatpush.msrb.mxu3 %v1150_v30  ;;  %435 = vmatpush.msrb.mxu2 %v998_v17 }
  0x44   :  { %395 = vmatpush.msrb.mxu1 %v998_v17  ;;  %356 = vmatpush.msrb.mxu0 %v1137_v12 }
  0x45   :  { %516 = vmatpush.msrb.mxu3 %v1167_v42  ;;  %437 = vmatpush.msrb.mxu2 %v1020_v25 }
  0x46   :  { %397 = vmatpush.msrb.mxu1 %v1020_v25  ;;  %360 = vmatpush.msrb.mxu0 %v1155_v32 }
  0x47   :  { %522 = vmatpush.msrb.mxu3 %v1180_v53  ;;  %439 = vmatpush.msrb.mxu2 %v1026_v28 }
  0x48   :  { %399 = vmatpush.msrb.mxu1 %v1026_v28  ;;  %364 = vmatpush.msrb.mxu0 %v1161_v39 }
  0x49   :  { %528 = vmatpush.msrb.mxu3 %v1194_v8  ;;  %441 = vmatpush.msrb.mxu2 %v1046_v35  ;;  %v828_v8 = vld [vmem:[#allocation5] ss:$0 sm:$0xff] }
  0x4a   :  { %401 = vmatpush.msrb.mxu1 %v1046_v35  ;;  %368 = vmatpush.msrb.mxu0 %v1185_v61 }
  0x4b   :  { %534 = vmatpush.msrb.mxu3 %v1205_v1  ;;  %443 = vmatpush.msrb.mxu2 %v1070_v45 }
  0x4c   :  { %403 = vmatpush.msrb.mxu1 %v1070_v45  ;;  %372 = vmatpush.msrb.mxu0 %v1199_v7 }
  0x4d   :  { %540 = vmatpush.msrb.mxu3 %v1216_v0  ;;  %445 = vmatpush.msrb.mxu2 %v1086_v51 }
  0x4e   :  { %405 = vmatpush.msrb.mxu1 %v1086_v51  ;;  %376 = vmatpush.msrb.mxu0 %v1210_v58 }
  0x4f   :  { %378 = vmatmul.f32.vlgmr.msrb.gmra.mxu0 %v1142_v18  ;;  %546 = vmatpush.msrb.mxu3 %v1224_v6 }
  0x50   :  { %407 = vmatpush.msrb.mxu1 %v1093_v54  ;;  %566 = vmatpush.msra.mxu0 %v990_v14  ;;  %v1404_v14 = vld [vmem:[#allocation19_spill] sm:$0xff] }
  0x51   :  { %552 = vmatpush.msrb.mxu3 %v1231_v31  ;;  %447 = vmatpush.msrb.mxu2 %v1093_v54  ;;  %v829_v31 = vld [vmem:[%s1379_s2] ss:$0 sm:$0xff] }
  0x52   :  { %409 = vmatpush.msrb.mxu1 %v1118_v63  ;;  %569 = vmatpush.msra.mxu0 %v993_v15 }
  0x53   :  { %558 = vmatpush.msrb.mxu3 %v1237_v44  ;;  %449 = vmatpush.msrb.mxu2 %v1118_v63 }
  0x54   :  { %411 = vmatpush.msrb.mxu1 %v1139_v13  ;;  %572 = vmatpush.msra.mxu0 %v996_v16 }
  0x55   :  { %727 = vmatpush.msra.mxu3 %v976_v3  ;;  %451 = vmatpush.msrb.mxu2 %v1139_v13 }
  0x56   :  { %413 = vmatpush.msrb.mxu1 %v1144_v26  ;;  %575 = vmatpush.msra.mxu0 %v1002_v19 }
  0x57   :  { %415 = vmatmul.f32.vlgmr.msrb.gmra.mxu1 %v1142_v18  ;;  %729 = vmatpush.msra.mxu3 %v978_v4 }
  0x58   :  { %619 = vmatpush.msra.mxu1 %v976_v3  ;;  %578 = vmatpush.msra.mxu0 %v1005_v20  ;;  %v1398_v3 = vld [vmem:[#allocation12_spill] sm:$0xff] }
  0x59   :  { %731 = vmatpush.msra.mxu3 %v980_v5  ;;  %453 = vmatpush.msrb.mxu2 %v1144_v26 }
  0x5a   :  { %621 = vmatpush.msra.mxu1 %v978_v4  ;;  %581 = vmatpush.msra.mxu0 %v1008_v21  ;;  %v1399_v4 = vld [vmem:[#allocation13_spill] sm:$0xff] }
  0x5b   :  { %733 = vmatpush.msra.mxu3 %v982_v9  ;;  %660 = vmatpush.msra.mxu2 %v1012_v22 }
  0x5c   :  { %623 = vmatpush.msra.mxu1 %v980_v5  ;;  %584 = vmatpush.msra.mxu0 %v1029_v29  ;;  %v1400_v5 = vld [vmem:[#allocation14_spill] sm:$0xff] }
  0x5d   :  { %735 = vmatpush.msra.mxu3 %v984_v10  ;;  %664 = vmatpush.msra.mxu2 %v1015_v23  ;;  %v1405_v29 = vld [vmem:[#allocation18_spill] sm:$0xff] }
  0x5e   :  { %625 = vmatpush.msra.mxu1 %v982_v9  ;;  %587 = vmatpush.msra.mxu0 %v1398_v3  ;;  %v1401_v9 = vld [vmem:[#allocation15_spill] sm:$0xff] }
  0x5f   :  { %737 = vmatpush.msra.mxu3 %v986_v11  ;;  %668 = vmatpush.msra.mxu2 %v1018_v24 }
  0x60   :  { %627 = vmatpush.msra.mxu1 %v984_v10  ;;  %590 = vmatpush.msra.mxu0 %v1399_v4  ;;  %v1402_v10 = vld [vmem:[#allocation16_spill] sm:$0xff] }
  0x61   :  { %739 = vmatpush.msra.mxu3 %v998_v17  ;;  %672 = vmatpush.msra.mxu2 %v1024_v27 }
  0x62   :  { %629 = vmatpush.msra.mxu1 %v986_v11  ;;  %593 = vmatpush.msra.mxu0 %v1400_v5  ;;  %v1403_v11 = vld [vmem:[#allocation17_spill] sm:$0xff] }
  0x63   :  { %741 = vmatpush.msra.mxu3 %v1020_v25  ;;  %676 = vmatpush.msra.mxu2 %v1040_v33 }
  0x64   :  { %631 = vmatpush.msra.mxu1 %v998_v17  ;;  %596 = vmatpush.msra.mxu0 %v1401_v9 }
  0x65   :  { %743 = vmatpush.msra.mxu3 %v1026_v28  ;;  %680 = vmatpush.msra.mxu2 %v1044_v34 }
  0x66   :  { %633 = vmatpush.msra.mxu1 %v1020_v25  ;;  %599 = vmatpush.msra.mxu0 %v1402_v10 }
  0x67   :  { %745 = vmatpush.msra.mxu3 %v1046_v35  ;;  %684 = vmatpush.msra.mxu2 %v1061_v41 }
  0x68   :  { %635 = vmatpush.msra.mxu1 %v1026_v28  ;;  %602 = vmatpush.msra.mxu0 %v1403_v11 }
  0x69   :  { %747 = vmatpush.msra.mxu3 %v1070_v45  ;;  %688 = vmatpush.msra.mxu2 %v1084_v50 }
  0x6a   :  { %637 = vmatpush.msra.mxu1 %v1046_v35  ;;  %605 = vmatpush.msra.mxu0 %v1404_v14 }
  0x6b   :  { %749 = vmatpush.msra.mxu3 %v1086_v51  ;;  %692 = vmatpush.msra.mxu2 %v1102_v57 }
  0x6c   :  { %639 = vmatpush.msra.mxu1 %v1070_v45  ;;  %608 = vmatpush.msra.mxu0 %v1172_v47 }
  0x6d   :  { %751 = vmatpush.msra.mxu3 %v1093_v54  ;;  %696 = vmatpush.msra.mxu2 %v1116_v62 }
  0x6e   :  { %641 = vmatpush.msra.mxu1 %v1086_v51  ;;  %611 = vmatpush.msra.mxu0 %v1188_v60 }
  0x6f   :  { %753 = vmatpush.msra.mxu3 %v1118_v63  ;;  %700 = vmatpush.msra.mxu2 %v1137_v12 }
  0x70   :  { %643 = vmatpush.msra.mxu1 %v1093_v54 }
  0x71   :  { %755 = vmatpush.msra.mxu3 %v1139_v13  ;;  %704 = vmatpush.msra.mxu2 %v1155_v32 }
  0x72   :  { %645 = vmatpush.msra.mxu1 %v1118_v63 }
  0x73   :  { %757 = vmatpush.msra.mxu3 %v1144_v26  ;;  %708 = vmatpush.msra.mxu2 %v1161_v39 }
  0x74   :  { %647 = vmatpush.msra.mxu1 %v1139_v13 }
  0x75   :  { %712 = vmatpush.msra.mxu2 %v1185_v61 }
  0x76   :  { %649 = vmatpush.msra.mxu1 %v1144_v26 }
  0x77   :  { %716 = vmatpush.msra.mxu2 %v1199_v7 }
  0x79   :  { %720 = vmatpush.msra.mxu2 %v1210_v58 }
  0xb0   :  { %v116_v16 = vpop.f32.mrf.mxu0 }
  0xb4   :  { %v217_v15 = vpop.f32.mrf.mxu1  ;;  %v310_v21 = vpop.f32.mrf.mxu3 }
  0xb5   :  { %v218_v17 = vadd.f32 %v217_v15, %v116_v16 }
  0xb6   :  { %v271_v19 = vpop.f32.mrf.mxu2 }
  0xb7   :  { %v272_v20 = vadd.f32 %v271_v19, %v218_v17 }
  0xb9   :  { %v311_v22 = vadd.f32 %v310_v21, %v272_v20 }
  0xcc   :  { %v379_v23 = vpop.f32.mrf.mxu0 }
  0xcd   :  { %v380_v24 = vadd.f32 %v379_v23, %v311_v22 }
  0xd4   :  { %v416_v25 = vpop.f32.mrf.mxu1 }
  0xd5   :  { %v417_v27 = vadd.f32 %v416_v25, %v380_v24 }
  0xd7   :  { %v419_v28 = vmul.f32 0.03125, %v417_v27 }
  0xd9   :  { %v420_v33 = vsub.f32 %v1405_v29, %v419_v28 }
  0xdb   :  { %v421_v34 = vmul.f32 %v420_v33, %v420_v33 }
  0xdd   :  { %v454_v35 = vand.u32 4294901760, %v421_v34 }
  0xdf   :  { %v455_v37 = vsub.f32 %v421_v34, %v454_v35  ;;  %560 = vmatmul.f32.vlgmr.msrb.gmra.mxu3 %v454_v35 }
  0xe1   :  { %614 = vmatmul.f32.vlgmr.msra.gmra.mxu0 %v455_v37  ;;  %v456_v38 = vand.u32 4294901760, %v455_v37 }
  0xe3   :  { %653 = vmatmul.f32.vlgmr.msra.gmra.mxu1 %v456_v38  ;;  %v457_v40 = vsub.f32 %v455_v37, %v456_v38 }
  0xe5   :  { %v458_v41 = vand.u32 4294901760, %v457_v40 }
  0xe7   :  { %459 = vmatmul.f32.vlgmr.msrb.gmra.mxu2 %v458_v41  ;;  %759 = vmatmul.f32.vlgmr.msra.gmra.mxu3 %v454_v35 }
  0xef   :  { %722 = vmatmul.f32.vlgmr.msra.gmra.mxu2 %v454_v35 }
 0x15e   :  { %v615_v49 = vpop.f32.mrf.mxu0 }
 0x160   :  { %v654_v51 = vpop.f32.mrf.mxu1 }
 0x162   :  { %v561_v43 = vpop.f32.mrf.mxu3 }
 0x16a   :  { %v460_v45 = vpop.f32.mrf.mxu2  ;;  %v760_v57 = vpop.f32.mrf.mxu3 }
 0x16b   :  { %v562_v46 = vadd.f32 %v561_v43, %v460_v45 }
 0x16d   :  { %v616_v50 = vadd.f32 %v615_v49, %v562_v46 }
 0x16f   :  { %v655_v52 = vadd.f32 %v654_v51, %v616_v50 }
 0x172   :  { %v723_v54 = vpop.f32.mrf.mxu2 }
 0x173   :  { %v724_v56 = vadd.f32 %v723_v54, %v655_v52 }
 0x175   :  { %v761_v58 = vadd.f32 %v760_v57, %v724_v56 }
 0x177   :  { %v763_v59 = vmul.f32 0.032258064, %v761_v58 }
 0x179   :  { %830 = vrsqrt.f32 %v763_v59  ;;  %vm771_vm0 = vcmp.eq.f32.partialorder %v763_v59, inf  ;;  %v774_v13 = vand.u32 2147483648, %v763_v59  ;;  %vm773_vm1 = vcmp.eq.f32.partialorder %v763_v59, 0.0 }
 0x17f   :  { %v831_v62 = vpop.eup %830 }
 0x180   :  { %v765_v63 = vmul.f32 %v831_v62, %v763_v59 }
 0x182   :  { %v766_v0 = vmul.f32 %v831_v62, %v765_v63 }
 0x184   :  { %v767_v2 = vmul.f32 0.5, %v766_v0 }
 0x186   :  { %v768_v6 = vsub.f32 1.5, %v767_v2 }
 0x188   :  { %v769_v7 = vmul.f32 %v831_v62, %v768_v6 }
 0x18a   :  { %v770_v12 = vmul.f32 %v769_v7, %v763_v59 }
 0x18c   :  { %v772_v18 = vsel %vm771_vm0, %v763_v59, %v770_v12 }
 0x18d   :  { %v775_v26 = vsel %vm773_vm1, %v774_v13, %v772_v18 }
 0x18e   :  { %v776_v30 = vadd.f32 1e-06, %v775_v26 }
 0x190   :  { %832 = vrcp.f32 %v776_v30  ;;  %v788_v42 = vand.u32 2147483648, %v776_v30  ;;  %v786_v48 = vand.u32 2147483647, %v776_v30  ;;  %vm782_vm3 = vweird.f32 %v776_v30 }
 0x192   :  { %v789_v61 = vor.u32 1.1754944e-38, %v788_v42  ;;  %vm787_vm5 = vcmp.eq.f32.partialorder %v786_v48, 8.507059e+37 }
 0x196   :  { %v833_v32 = vpop.eup %832 }
 0x197   :  { %v778_v36 = vmul.f32 %v833_v32, %v776_v30  ;;  %vm783_vm2 = vweird.f32 %v833_v32 }
 0x198   :  { %vm784_vm4 = vmor %vm782_vm3, %vm783_vm2 }
 0x199   :  { %v779_v39 = vsub.f32 1.0, %v778_v36 }
 0x19b   :  { %v780_v47 = vmul.f32 %v833_v32, %v779_v39 }
 0x19d   :  { %v781_v53 = vadd.f32 %v833_v32, %v780_v47 }
 0x19f   :  { %v785_v60 = vsel %vm784_vm4, %v833_v32, %v781_v53 }
 0x1a0   :  { %v790_v1 = vsel %vm787_vm5, %v789_v61, %v785_v60 }
 0x1a1   :  { %v793_v55 = vmul.f32 %v790_v1, %v420_v33 }
 0x1a3   :  { %v797_v44 = vmul.f32 %v828_v8, %v793_v55 }
 0x1a5   :  { %v802_v3 = vadd.f32 %v829_v31, %v797_v44 }
 0x1a7   :  { %803 = vst [vmem:[#allocation8] sm:$0xf] %v802_v3 }
 0x1a8   :  { %814 = dma.vmem_to_hbm [thread:$0]  %s810_s6, 64, %s812_s9, [#allocation4]  }
 0x1a9   :  { %934 = dma.done.wait [#allocation4], 64  }
 0x1aa   :  { %935 = vsyncadd [#allocation4], 4294967232 }
 0x1ab   :  { %819 = vsyncpa [#allocation3], 1 }
 0x1ac   :  { %820 = vsyncpa [#allocation6], 1 }
 0x1ad   :  { %821 = vsyncpa [#allocation4], 1 }

</bundles_post_ra>
